<compile_context>
chip_gen: v7x
topology: tpu7x:2x2x1
jax: 0.10.0
libtpu: 0.0.40
codegen_flags: <defaults>
</compile_context>

<pallas_src>
import jax
import jax.numpy as jnp
from jax.experimental import pallas as pl
from jax.experimental.pallas import tpu as pltpu


# ---------------------------------------------------------------------------
# Primary path: single direct HBM -> HBM DMA copy (Pallas kernel).
# ---------------------------------------------------------------------------
def _dma_copy_kernel(src_hbm_ref, dst_hbm_ref, copy_sem):
    copy = pltpu.make_async_copy(src_hbm_ref, dst_hbm_ref, copy_sem)
    copy.start()
    copy.wait()


def fixed_positional_encoder(positions, x=None, padding_mask=None):
    """FixedPositionalEncoder.forward: returns `positions` (x/mask ignored).

    Implemented as one direct HBM->HBM DMA into a fresh output buffer:
    no VMEM staging, no grid, bandwidth-bound on all TPU generations.
    """
    del x, padding_mask  # unused, per reference semantics
    nbytes = positions.size * positions.dtype.itemsize
    return pl.pallas_call(
        _dma_copy_kernel,
        out_shape=jax.ShapeDtypeStruct(positions.shape, positions.dtype),
        in_specs=[pl.BlockSpec(memory_space=pl.ANY)],
        out_specs=pl.BlockSpec(memory_space=pl.ANY),
        scratch_shapes=[pltpu.SemaphoreType.DMA],
        cost_estimate=pl.CostEstimate(
            flops=0, transcendentals=0, bytes_accessed=2 * nbytes),
    )(positions)


# ---------------------------------------------------------------------------
# Zero-copy path: pure identity (recommended when no Pallas boundary needed).
# ---------------------------------------------------------------------------
def fixed_positional_encoder_zero_copy(positions, x=None, padding_mask=None):
    """Truly zero-copy forward: returns `positions` as-is (no kernel launch)."""
    del x, padding_mask  # unused, per reference semantics
    return positions


# ---------------------------------------------------------------------------
# Alternative: tiled, lane-dense, software-pipelined VMEM copy.
# ---------------------------------------------------------------------------
def _tiled_copy_kernel(src_ref, dst_ref):
    dst_ref[...] = src_ref[...]


def fixed_positional_encoder_tiled(positions, x=None, padding_mask=None):
    """Same semantics via a tuned tiled copy (kept as an alternative path)."""
    del x, padding_mask  # unused, per reference semantics
    orig_shape = positions.shape
    dtype = positions.dtype
    n = positions.size
    itemsize = positions.dtype.itemsize
    nbytes = n * itemsize

    # Widest lane-dense (multiple-of-128) last dim that divides n.
    lanes = 0
    for cand in (4096, 2048, 1024, 512, 256, 128):
        if n % cand == 0:
            lanes = cand
            break
    if lanes == 0:
        # Cannot form a lane-dense slab: the direct HBM->HBM DMA path has no
        # layout or VMEM constraints, so route through it instead.
        return fixed_positional_encoder(positions)

    rows = n // lanes
    flat = positions.reshape(rows, lanes)

    # dtype-dependent sublane alignment (f32: 8, bf16: 16, int8/fp8: 32 rows).
    align = max(8, 32 // itemsize)

    # ~4 MiB tiles; 2x(in + out) double buffers ~= 16 MiB, covered by the
    # explicit 32 MiB VMEM limit below (safe on v5e/v6e/v7x).
    tile_bytes_cap = 4 * 1024 * 1024
    max_rows = max(align, (tile_bytes_cap // (lanes * itemsize)) // align * align)
    tile_rows = rows if rows <= max_rows else max_rows

    # v7x has 2 TensorCores: ensure a >= 1 MiB table splits into >= 2 tiles so
    # the "parallel" grid axis can feed both cores (no-op on v5e/v6e).
    if tile_rows == rows and nbytes >= (1 << 20) and rows >= 2 * align:
        tile_rows = max(align, (rows // 2) // align * align)

    grid = (pl.cdiv(rows, tile_rows),)

    out_flat = pl.pallas_call(
        _tiled_copy_kernel,
        out_shape=jax.ShapeDtypeStruct((rows, lanes), dtype),
        grid=grid,
        in_specs=[pl.BlockSpec((tile_rows, lanes), lambda i: (i, 0))],
        out_specs=pl.BlockSpec((tile_rows, lanes), lambda i: (i, 0)),
        compiler_params=pltpu.CompilerParams(
            dimension_semantics=("parallel",),
            vmem_limit_bytes=32 * 1024 * 1024,
        ),
        cost_estimate=pl.CostEstimate(
            flops=0, transcendentals=0, bytes_accessed=2 * nbytes),
    )(flat)
    return out_flat.reshape(orig_shape)


if __name__ == "__main__":
    key = jax.random.PRNGKey(0)
    k_pos, k_x = jax.random.split(key)

    batch, seq, dim = 2, 8, 32

    # Deterministic "parameter": the fixed positional-embedding table.
    pos_embed = jax.random.normal(k_pos, (1, seq, dim), dtype=jnp.float32)

    # Inputs the forward pass ignores.
    x = jax.random.normal(k_x, (batch, seq, dim), dtype=jnp.float32)
    padding_mask = jnp.zeros((batch, seq), dtype=jnp.bool_)

    expected = jax.device_get(pos_embed)

    # Primary Pallas path: direct HBM->HBM DMA copy.
    out_dma = jax.block_until_ready(
        fixed_positional_encoder(pos_embed, x, padding_mask))
    assert out_dma.shape == expected.shape
    assert out_dma.dtype == expected.dtype
    assert (jax.device_get(out_dma) == expected).all()

    # Tiled VMEM-staged alternative.
    out_tiled = jax.block_until_ready(
        fixed_positional_encoder_tiled(pos_embed, x, padding_mask))
    assert out_tiled.shape == expected.shape
    assert out_tiled.dtype == expected.dtype
    assert (jax.device_get(out_tiled) == expected).all()

    # Zero-copy identity path.
    out_id = jax.block_until_ready(
        fixed_positional_encoder_zero_copy(pos_embed, x, padding_mask))
    assert out_id.shape == expected.shape
    assert out_id.dtype == expected.dtype
    assert (jax.device_get(out_id) == expected).all()

    print("KERNEL_OK")
</pallas_src>

<mosaic_0001>
module attributes {stable_mosaic.version = 11 : i64} {
  func.func @_dma_copy_kernel(%arg0: memref<1x8x32xf32, #tpu.memory_space<any>>, %arg1: memref<1x8x32xf32, #tpu.memory_space<any>>, %arg2: memref<!tpu.dma_semaphore, #tpu.memory_space<semaphore_mem>>) attributes {dimension_semantics = [], scalar_prefetch = 0 : i64, scratch_operands = 1 : i64, tpu.core_type = #tpu.core_type<tc>} {
    tpu.enqueue_dma source(%arg0 : memref<1x8x32xf32, #tpu.memory_space<any>>) target(%arg1 : memref<1x8x32xf32, #tpu.memory_space<any>>) target_semaphore(%arg2 : memref<!tpu.dma_semaphore, #tpu.memory_space<semaphore_mem>>)
    tpu.wait_dma2 semaphore(%arg2 : memref<!tpu.dma_semaphore, #tpu.memory_space<semaphore_mem>>) src(%arg0 : memref<1x8x32xf32, #tpu.memory_space<any>>) dst(%arg1 : memref<1x8x32xf32, #tpu.memory_space<any>>)
    return
  }
}

</mosaic_0001>

<bundles_post_ra>
// kernel: tpu_custom_call.1
= control target key start
LH: loop header
LB: loop body
LE: loop exit
PB: predicated region body
PF: predicated region fallthrough
CT: control target
= control target key end

     0   :  { %s35_s6 = smov [#allocation2]   ;;  %s36_s7 = smov [#allocation3]   ;;  %s54_s0 = inlined_call_operand.hbm [shape: f32[1,8,32], index: 0, kind: input, shape index: {}]   ;;  %s55_s1 = inlined_call_operand.hbm [shape: f32[1,8,32], index: 1, kind: output, shape index: {}]  }
   0x1   :  { %s37_s8 = smov 0  }
   0x2   :  { %18 = dma.general %s54_s0, 128, %s55_s1, %s35_s6, %s36_s7, [#allocation4], %s37_s8, 0  }
   0x3   :  { %33 = dma.done.wait [#allocation2], 128 }
   0x4   :  { %34 = vsyncadd [#allocation2], 4294967168 }
   0x5   :  { %23 = vsyncmov [#allocation2] }
   0x8   :  { %s24_s13 = vpop.sfrf %23 }
   0x9   :  { %p29_p0 = scmp.ne.s32.totalorder %s24_s13, 0 }
   0xb   :  { %28 = shalt.err (%p29_p0)  }

</bundles_post_ra>
